<compile_context>
chip_gen: v5e
topology: v5e:2x2
jax: 0.10.0
libtpu: 0.0.40
codegen_flags: <defaults>
</compile_context>

<pallas_src>
import functools

import jax
import jax.numpy as jnp
from jax import lax
from jax.experimental import pallas as pl
from jax.experimental.pallas import tpu as pltpu


def _quantile_loss_kernel(x_ref, y_ref, o_ref, *, quantiles, inv_n):
    nq = len(quantiles)

    x = x_ref[...].astype(jnp.float32)     # (N, Q) predictions, native layout
    y = y_ref[...].astype(jnp.float32)     # (N, 1) targets

    # Build the (1, Q) quantile row from trace-time scalar constants
    # (iota + selects — avoids relying on dense non-splat vector constants).
    col = lax.broadcasted_iota(jnp.int32, (1, nq), 1)          # (1, Q): 0..Q-1
    q = jnp.zeros((1, nq), jnp.float32)
    for i, qv in enumerate(quantiles):
        q = jnp.where(col == i, jnp.float32(qv), q)
    qm1 = q - 1.0

    diff = y - x                                               # (N, Q)
    # Pinball, two-mul + max form:
    #   diff > 0 -> q*diff ; diff <= 0 -> (q-1)*diff  ==  max(q*diff, (q-1)*diff)
    pin = jnp.maximum(q * diff, qm1 * diff)                    # (N, Q)

    # mean over rows of (sum over quantiles)  ==  sum(all pinball) / N
    o_ref[0, 0] = jnp.sum(pin) * inv_n                         # scalar -> SMEM


def quantile_loss(x, y, quantiles):
    """x: (N, Q) predictions (one column per quantile), y: (N, 1) or (N,)
    targets, quantiles: length-Q sequence of levels in (0,1) -> scalar f32."""
    n, nq = x.shape
    if y.ndim == 1:
        y = y.reshape(n, 1)

    # Trace-time constants closed over by the kernel (no VMEM input / DMA).
    qs = tuple(float(q) for q in quantiles)
    assert len(qs) == nq

    kernel = functools.partial(_quantile_loss_kernel,
                               quantiles=qs, inv_n=1.0 / n)

    out = pl.pallas_call(
        kernel,
        out_shape=jax.ShapeDtypeStruct((1, 1), jnp.float32),
        in_specs=[
            pl.BlockSpec(memory_space=pltpu.MemorySpace.VMEM),   # x (N, Q)
            pl.BlockSpec(memory_space=pltpu.MemorySpace.VMEM),   # y (N, 1)
        ],
        out_specs=pl.BlockSpec(memory_space=pltpu.MemorySpace.SMEM),
    )(x, y)
    return out[0, 0]


def _reference(x, y, quantiles):
    """Plain-JAX reference mirroring the PyTorch per-quantile loop."""
    y = y.reshape(x.shape[0], 1)
    cols = []
    for i, q in enumerate(quantiles):
        diff = y - x[:, i].reshape(-1, 1)
        idx = (diff > 0).astype(jnp.float32)
        cols.append(diff * (q - 1.0) * (1.0 - idx) + q * idx * diff)
    tot = jnp.concatenate(cols, axis=1)
    return jnp.mean(jnp.sum(tot, axis=1))


if __name__ == "__main__":
    N = 250          # the module's dead-code block assumes 250 samples
    quantiles = (0.1, 0.5, 0.9, 0.99)
    Q = len(quantiles)

    key = jax.random.PRNGKey(0)
    kx, ky = jax.random.split(key)
    x = jax.random.normal(kx, (N, Q), dtype=jnp.float32)   # per-quantile predictions
    y = jax.random.normal(ky, (N, 1), dtype=jnp.float32)   # targets

    loss = quantile_loss(x, y, quantiles)
    jax.block_until_ready(loss)

    ref = _reference(x, y, list(quantiles))
    assert jnp.allclose(loss, ref, rtol=1e-5, atol=1e-5), (loss, ref)

    print("KERNEL_OK")
</pallas_src>

<mosaic_0001>
module attributes {stable_mosaic.version = 11 : i64} {
  func.func @_quantile_loss_kernel(%arg0: memref<250x4xf32, #tpu.memory_space<vmem>>, %arg1: memref<250x1xf32, #tpu.memory_space<vmem>>, %arg2: memref<1x1xf32, #tpu.memory_space<smem>>) attributes {dimension_semantics = [], scalar_prefetch = 0 : i64, scratch_operands = 0 : i64, tpu.core_type = #tpu.core_type<tc>} {
    %c0 = arith.constant 0 : index
    %c0_0 = arith.constant 0 : index
    %0 = vector.load %arg0[%c0, %c0_0] : memref<250x4xf32, #tpu.memory_space<vmem>>, vector<250x4xf32>
    %c0_1 = arith.constant 0 : index
    %c0_2 = arith.constant 0 : index
    %1 = vector.load %arg1[%c0_1, %c0_2] : memref<250x1xf32, #tpu.memory_space<vmem>>, vector<250x1xf32>
    %2 = tpu.iota {dimensions = array<i32: 1>} : vector<1x4xi32>
    %cst = arith.constant 0.000000e+00 : f32
    %3 = vector.broadcast %cst : f32 to vector<1x4xf32>
    %c0_i32 = arith.constant 0 : i32
    %4 = vector.broadcast %c0_i32 : i32 to vector<1x4xi32>
    %5 = arith.cmpi eq, %2, %4 : vector<1x4xi32>
    %cst_3 = arith.constant 1.000000e-01 : f32
    %6 = vector.broadcast %cst_3 : f32 to vector<1x4xf32>
    %7 = arith.select %5, %6, %3 : vector<1x4xi1>, vector<1x4xf32>
    %c1_i32 = arith.constant 1 : i32
    %8 = vector.broadcast %c1_i32 : i32 to vector<1x4xi32>
    %9 = arith.cmpi eq, %2, %8 : vector<1x4xi32>
    %cst_4 = arith.constant 5.000000e-01 : f32
    %10 = vector.broadcast %cst_4 : f32 to vector<1x4xf32>
    %11 = arith.select %9, %10, %7 : vector<1x4xi1>, vector<1x4xf32>
    %c2_i32 = arith.constant 2 : i32
    %12 = vector.broadcast %c2_i32 : i32 to vector<1x4xi32>
    %13 = arith.cmpi eq, %2, %12 : vector<1x4xi32>
    %cst_5 = arith.constant 0.899999976 : f32
    %14 = vector.broadcast %cst_5 : f32 to vector<1x4xf32>
    %15 = arith.select %13, %14, %11 : vector<1x4xi1>, vector<1x4xf32>
    %c3_i32 = arith.constant 3 : i32
    %16 = vector.broadcast %c3_i32 : i32 to vector<1x4xi32>
    %17 = arith.cmpi eq, %2, %16 : vector<1x4xi32>
    %cst_6 = arith.constant 9.900000e-01 : f32
    %18 = vector.broadcast %cst_6 : f32 to vector<1x4xf32>
    %19 = arith.select %17, %18, %15 : vector<1x4xi1>, vector<1x4xf32>
    %cst_7 = arith.constant 1.000000e+00 : f32
    %20 = vector.broadcast %cst_7 : f32 to vector<1x4xf32>
    %21 = arith.subf %19, %20 : vector<1x4xf32>
    %22 = vector.broadcast %1 : vector<250x1xf32> to vector<250x4xf32>
    %23 = arith.subf %22, %0 : vector<250x4xf32>
    %24 = vector.broadcast %19 : vector<1x4xf32> to vector<250x4xf32>
    %25 = arith.mulf %24, %23 : vector<250x4xf32>
    %26 = vector.broadcast %21 : vector<1x4xf32> to vector<250x4xf32>
    %27 = arith.mulf %26, %23 : vector<250x4xf32>
    %28 = arith.maximumf %25, %27 : vector<250x4xf32>
    %29 = vector.shape_cast %28 : vector<250x4xf32> to vector<1x250x4xf32>
    %cst_8 = arith.constant dense<0.000000e+00> : vector<1xf32>
    %30 = vector.multi_reduction <add>, %29, %cst_8 [1, 2] : vector<1x250x4xf32> to vector<1xf32>
    %31 = vector.shape_cast %30 : vector<1xf32> to vector<1x1x1xf32>
    %32 = vector.extract %31[0, 0, 0] : f32 from vector<1x1x1xf32>
    %cst_9 = arith.constant 4.000000e-03 : f32
    %33 = arith.mulf %32, %cst_9 : f32
    %c0_10 = arith.constant 0 : index
    %c0_11 = arith.constant 0 : index
    %34 = memref.load %arg2[%c0_10, %c0_11] : memref<1x1xf32, #tpu.memory_space<smem>>
    memref.store %33, %arg2[%c0_10, %c0_11] : memref<1x1xf32, #tpu.memory_space<smem>>
    return
  }
}

</mosaic_0001>

<bundles_post_ra>
// kernel: tpu_custom_call.1
= control target key start
LH: loop header
LB: loop body
LE: loop exit
PB: predicated region body
PF: predicated region fallthrough
CT: control target
= control target key end

     0   :  { %v490_v3 = vmov 0   ;;  %s803_s0 = inlined_call_operand.vmem [shape: f32[250,4], index: 0, kind: input, shape index: {}]   ;;  %s804_s1 = inlined_call_operand.vmem [shape: f32[250,1], index: 1, kind: input, shape index: {}]   ;;  %s805_s2 = inlined_call_operand.hbm [shape: f32[1,1], index: 2, kind: output, shape index: {}]  }
   0x1   :  { %v48_v0 = vld [vmem:[%s804_s1 + $0x20] sm:$0xff]  ;;  %v46_v1 = vld [vmem:[%s804_s1 + $0x10] sm:$0xff]  ;;  %475 = vset.pattern.permute.xlu2 %v490_v3  ;;  %474 = vset.pattern.permute.xlu1 %v490_v3 }
   0x2   :  { %v44_v2 = vld [vmem:[%s804_s1] sm:$0xff]  ;;  %473 = vset.pattern.permute.xlu0 %v490_v3  ;;  %109 = vperm.xlu2 %475, %v48_v0  }
   0x3   :  { %99 = vperm.xlu1 %474, %v46_v1   ;;  %89 = vperm.xlu0 %473, %v44_v2  }
   0x4   :  { %7 = vsyncpa [#allocation3], 0  ;;  %v49_v4 = vld [vmem:[%s804_s1 + $0x28] sm:$0xff]  ;;  %v47_v5 = vld [vmem:[%s804_s1 + $0x18] sm:$0xff]  ;;  %v76_v33 = vlaneseq  ;;  %v491_v37 = vmov 0.0   ;;  %vm375_vm4 = vcmask 31744  }
   0x5   :  { %v45_v6 = vld [vmem:[%s804_s1 + $0x8] sm:$0xff]  ;;  %v52_v7 = vld [vmem:[%s804_s1 + $0x40] sm:$0xff]  ;;  %v51_v8 = vld [vmem:[%s804_s1 + $0x38] sm:$0xff]  ;;  %vm437_vm5 = vcmask 25600   ;;  %s457_s23 = sshll.u32 %s805_s2, 4  ;;  %s492_s26 = smov [#allocation2]   ;;  %s458_s23 = int_to_ptr.hbm [resolvable:$true] %s457_s23 }
   0x6   :  { %v50_v9 = vld [vmem:[%s804_s1 + $0x30] sm:$0xff]  ;;  %v55_v10 = vld [vmem:[%s804_s1 + $0x58] sm:$0xff]  ;;  %v53_v12 = vld [vmem:[%s804_s1 + $0x48] sm:$0xff]  ;;  %v77_v35 = vand.u32 127, %v76_v33 }
   0x7   :  { %v54_v11 = vld [vmem:[%s804_s1 + $0x50] sm:$0xff]  ;;  %v57_v14 = vld [vmem:[%s804_s1 + $0x68] sm:$0xff]  ;;  %v56_v15 = vld [vmem:[%s804_s1 + $0x60] sm:$0xff] }
   0x8   :  { %v58_v13 = vld [vmem:[%s804_s1 + $0x70] sm:$0xff]  ;;  %v61_v16 = vld [vmem:[%s804_s1 + $0x88] sm:$0xff]  ;;  %v60_v17 = vld [vmem:[%s804_s1 + $0x80] sm:$0xff]  ;;  %vm78_vm0 = vcmp.eq.s32.totalorder %v77_v35, 0  ;;  %vm80_vm1 = vcmp.eq.s32.totalorder %v77_v35, 1  ;;  %vm82_vm2 = vcmp.eq.s32.totalorder %v77_v35, 2 }
   0x9   :  { %v59_v18 = vld [vmem:[%s804_s1 + $0x78] sm:$0xff]  ;;  %v64_v19 = vld [vmem:[%s804_s1 + $0xa0] sm:$0xff]  ;;  %v62_v21 = vld [vmem:[%s804_s1 + $0x90] sm:$0xff]  ;;  %v79_v38 = vsel %vm78_vm0, 0.1, %v491_v37  ;;  %vm84_vm3 = vcmp.eq.s32.totalorder %v77_v35, 3 }
   0xa   :  { %114 = vperm.xlu2 %475, %v49_v4   ;;  %v63_v20 = vld [vmem:[%s804_s1 + $0x98] sm:$0xff]  ;;  %v66_v23 = vld [vmem:[%s804_s1 + $0xb0] sm:$0xff]  ;;  %v65_v24 = vld [vmem:[%s804_s1 + $0xa8] sm:$0xff]  ;;  %v81_v39 = vsel %vm80_vm1, 0.5, %v79_v38 }
   0xb   :  { %104 = vperm.xlu1 %474, %v47_v5   ;;  %94 = vperm.xlu0 %473, %v45_v6   ;;  %v67_v22 = vld [vmem:[%s804_s1 + $0xb8] sm:$0xff]  ;;  %v70_v25 = vld [vmem:[%s804_s1 + $0xd0] sm:$0xff]  ;;  %v69_v26 = vld [vmem:[%s804_s1 + $0xc8] sm:$0xff]  ;;  %v83_v40 = vsel %vm82_vm2, 0.9, %v81_v39 }
   0xc   :  { %v68_v27 = vld [vmem:[%s804_s1 + $0xc0] sm:$0xff]  ;;  %v73_v28 = vld [vmem:[%s804_s1 + $0xe8] sm:$0xff]  ;;  %v71_v30 = vld [vmem:[%s804_s1 + $0xd8] sm:$0xff]  ;;  %v604_v41 = vsel %vm84_vm3, 0.99, %v83_v40 }
   0xd   :  { %v72_v29 = vld [vmem:[%s804_s1 + $0xe0] sm:$0xff]  ;;  %v75_v31 = vld [vmem:[%s804_s1 + $0xf8] sm:$0x3]  ;;  %v74_v32 = vld [vmem:[%s804_s1 + $0xf0] sm:$0xff]  ;;  %v610_v46 = vadd.f32 -1.0, %v604_v41 }
   0xe   :  { %v12_v43 = vld [vmem:[%s803_s0] sm:$0xff]  ;;  %v14_v47 = vld [vmem:[%s803_s0 + $0x10] sm:$0xff]  ;;  %v15_v53 = vld [vmem:[%s803_s0 + $0x18] sm:$0xff] }
   0xf   :  { %v16_v49 = vld [vmem:[%s803_s0 + $0x20] sm:$0xff]  ;;  %v13_v54 = vld [vmem:[%s803_s0 + $0x8] sm:$0xff]  ;;  %v23_v39 = vld [vmem:[%s803_s0 + $0x58] sm:$0xff] }
  0x10   :  { %v17_v55 = vld [vmem:[%s803_s0 + $0x28] sm:$0xff] }
  0x12   :  { %129 = vperm.xlu2 %475, %v52_v7  }
  0x13   :  { %124 = vperm.xlu1 %474, %v51_v8   ;;  %119 = vperm.xlu0 %473, %v50_v9   ;;  %v20_v8 = vld [vmem:[%s803_s0 + $0x40] sm:$0xff] }
  0x1a   :  { %144 = vperm.xlu2 %475, %v55_v10  }
  0x1b   :  { %139 = vperm.xlu1 %474, %v54_v11   ;;  %134 = vperm.xlu0 %473, %v53_v12  }
  0x22   :  { %159 = vperm.xlu2 %475, %v58_v13  }
  0x23   :  { %154 = vperm.xlu1 %474, %v57_v14   ;;  %149 = vperm.xlu0 %473, %v56_v15   ;;  %v19_v14 = vld [vmem:[%s803_s0 + $0x38] sm:$0xff]  ;;  %v18_v15 = vld [vmem:[%s803_s0 + $0x30] sm:$0xff] }
  0x2a   :  { %174 = vperm.xlu2 %475, %v61_v16  }
  0x2b   :  { %169 = vperm.xlu1 %474, %v60_v17   ;;  %164 = vperm.xlu0 %473, %v59_v18  }
  0x32   :  { %189 = vperm.xlu2 %475, %v64_v19  }
  0x33   :  { %184 = vperm.xlu1 %474, %v63_v20   ;;  %179 = vperm.xlu0 %473, %v62_v21  }
  0x3a   :  { %204 = vperm.xlu2 %475, %v67_v22  }
  0x3b   :  { %199 = vperm.xlu1 %474, %v66_v23   ;;  %194 = vperm.xlu0 %473, %v65_v24  }
  0x42   :  { %219 = vperm.xlu2 %475, %v70_v25  }
  0x43   :  { %214 = vperm.xlu1 %474, %v69_v26   ;;  %209 = vperm.xlu0 %473, %v68_v27  }
  0x4a   :  { %234 = vperm.xlu2 %475, %v73_v28  }
  0x4b   :  { %229 = vperm.xlu1 %474, %v72_v29   ;;  %224 = vperm.xlu0 %473, %v71_v30  }
  0x53   :  { %244 = vperm.xlu1 %474, %v75_v31   ;;  %239 = vperm.xlu0 %473, %v74_v32  }
  0x5c   :  { %v110_v34 = vpop.permute.xlu2 %109 }
  0x5d   :  { %v251_v56 = vsub.f32 %v110_v34, %v16_v49 }
  0x5f   :  { %v283_v6 = vmul.f32 %v251_v56, %v604_v41  ;;  %v315_v7 = vmul.f32 %v610_v46, %v251_v56 }
  0x61   :  { %v347_v22 = vmax.f32 %v283_v6, %v315_v7  ;;  %v25_v6 = vld [vmem:[%s803_s0 + $0x68] sm:$0xff]  ;;  %v24_v7 = vld [vmem:[%s803_s0 + $0x60] sm:$0xff] }
  0x63   :  { %v383_v37 = vsel %vm375_vm4, %v347_v22, 0.0 }
  0x64   :  { %v115_v36 = vpop.permute.xlu2 %114 }
  0x65   :  { %v252_v0 = vsub.f32 %v115_v36, %v17_v55 }
  0x67   :  { %v284_v11 = vmul.f32 %v252_v0, %v604_v41  ;;  %v316_v12 = vmul.f32 %v610_v46, %v252_v0 }
  0x69   :  { %v348_v26 = vmax.f32 %v284_v11, %v316_v12 }
  0x6c   :  { %v130_v42 = vpop.permute.xlu2 %129 }
  0x6d   :  { %v255_v18 = vsub.f32 %v130_v42, %v20_v8 }
  0x6f   :  { %v287_v34 = vmul.f32 %v255_v18, %v604_v41  ;;  %v319_v35 = vmul.f32 %v610_v46, %v255_v18 }
  0x74   :  { %v145_v59 = vpop.permute.xlu2 %144 }
  0x75   :  { %v100_v44 = vpop.permute.xlu1 %99  ;;  %v90_v45 = vpop.permute.xlu0 %89 }
  0x76   :  { %v247_v48 = vsub.f32 %v90_v45, %v12_v43  ;;  %v249_v50 = vsub.f32 %v100_v44, %v14_v47  ;;  %v22_v43 = vld [vmem:[%s803_s0 + $0x50] sm:$0xff]  ;;  %v21_v44 = vld [vmem:[%s803_s0 + $0x48] sm:$0xff]  ;;  %v385_v45 = vsel %vm375_vm4, %v348_v26, 0.0  ;;  %v351_v47 = vmax.f32 %v287_v34, %v319_v35 }
  0x78   :  { %v279_v51 = vmul.f32 %v247_v48, %v604_v41  ;;  %v311_v52 = vmul.f32 %v610_v46, %v247_v48  ;;  %v281_v60 = vmul.f32 %v249_v50, %v604_v41  ;;  %v313_v61 = vmul.f32 %v610_v46, %v249_v50 }
  0x7a   :  { %v343_v1 = vmax.f32 %v279_v51, %v311_v52  ;;  %v345_v9 = vmax.f32 %v281_v60, %v313_v61  ;;  %v258_v51 = vsub.f32 %v145_v59, %v23_v39 }
  0x7c   :  { %v376_v16 = vsel %vm375_vm4, %v343_v1, 0.0  ;;  %v379_v23 = vsel %vm375_vm4, %v345_v9, 0.0  ;;  %v160_v29 = vpop.permute.xlu2 %159  ;;  %v290_v59 = vmul.f32 %v258_v51, %v604_v41  ;;  %v322_v0 = vmul.f32 %v610_v46, %v258_v51  ;;  %v26_v1 = vld [vmem:[%s803_s0 + $0x70] sm:$0xff]  ;;  %v32_v51 = vld [vmem:[%s803_s0 + $0xa0] sm:$0xff] }
  0x7d   :  { %v105_v57 = vpop.permute.xlu1 %104  ;;  %v95_v58 = vpop.permute.xlu0 %94  ;;  %v261_v9 = vsub.f32 %v160_v29, %v26_v1  ;;  %v28_v29 = vld [vmem:[%s803_s0 + $0x80] sm:$0xff] }
  0x7e   :  { %v250_v62 = vsub.f32 %v105_v57, %v15_v53  ;;  %v248_v63 = vsub.f32 %v95_v58, %v13_v54 }
  0x7f   :  { %v293_v22 = vmul.f32 %v261_v9, %v604_v41 }
  0x80   :  { %v282_v2 = vmul.f32 %v250_v62, %v604_v41  ;;  %v314_v3 = vmul.f32 %v610_v46, %v250_v62  ;;  %v280_v4 = vmul.f32 %v248_v63, %v604_v41  ;;  %v312_v5 = vmul.f32 %v610_v46, %v248_v63 }
  0x81   :  { %v391_v62 = vsel %vm375_vm4, %v351_v47, 0.0 }
  0x82   :  { %v344_v10 = vmax.f32 %v280_v4, %v312_v5  ;;  %v346_v13 = vmax.f32 %v282_v2, %v314_v3 }
  0x84   :  { %v377_v17 = vsel %vm375_vm4, %v344_v10, 0.0  ;;  %v381_v27 = vsel %vm375_vm4, %v346_v13, 0.0  ;;  %v175_v2 = vpop.permute.xlu2 %174  ;;  %v354_v13 = vmax.f32 %v290_v59, %v322_v0 }
  0x85   :  { %v378_v19 = vadd.f32 %v377_v17, %v376_v16  ;;  %v125_v20 = vpop.permute.xlu1 %124  ;;  %v120_v21 = vpop.permute.xlu0 %119 }
  0x86   :  { %v254_v24 = vsub.f32 %v125_v20, %v19_v14  ;;  %v253_v25 = vsub.f32 %v120_v21, %v18_v15 }
  0x87   :  { %v380_v28 = vadd.f32 %v379_v23, %v378_v19  ;;  %v325_v23 = vmul.f32 %v610_v46, %v261_v9 }
  0x88   :  { %v286_v30 = vmul.f32 %v254_v24, %v604_v41  ;;  %v318_v31 = vmul.f32 %v610_v46, %v254_v24  ;;  %v285_v32 = vmul.f32 %v253_v25, %v604_v41  ;;  %v317_v33 = vmul.f32 %v610_v46, %v253_v25 }
  0x89   :  { %v382_v36 = vadd.f32 %v381_v27, %v380_v28  ;;  %v397_v24 = vsel %vm375_vm4, %v354_v13, 0.0  ;;  %v29_v27 = vld [vmem:[%s803_s0 + $0x88] sm:$0xff]  ;;  %v35_v13 = vld [vmem:[%s803_s0 + $0xb8] sm:$0xff] }
  0x8a   :  { %v349_v38 = vmax.f32 %v285_v32, %v317_v33  ;;  %v350_v40 = vmax.f32 %v286_v30, %v318_v31  ;;  %v27_v30 = vld [vmem:[%s803_s0 + $0x78] sm:$0xff]  ;;  %v357_v33 = vmax.f32 %v293_v22, %v325_v23 }
  0x8b   :  { %v384_v42 = vadd.f32 %v383_v37, %v382_v36  ;;  %v264_v37 = vsub.f32 %v175_v2, %v29_v27 }
  0x8c   :  { %v387_v52 = vsel %vm375_vm4, %v349_v38, 0.0  ;;  %v389_v55 = vsel %vm375_vm4, %v350_v40, 0.0  ;;  %v190_v31 = vpop.permute.xlu2 %189 }
  0x8d   :  { %v386_v48 = vadd.f32 %v385_v45, %v384_v42  ;;  %v140_v49 = vpop.permute.xlu1 %139  ;;  %v135_v50 = vpop.permute.xlu0 %134 }
  0x8e   :  { %v257_v53 = vsub.f32 %v140_v49, %v22_v43  ;;  %v256_v54 = vsub.f32 %v135_v50, %v21_v44  ;;  %v296_v49 = vmul.f32 %v264_v37, %v604_v41  ;;  %v328_v50 = vmul.f32 %v610_v46, %v264_v37 }
  0x8f   :  { %v388_v56 = vadd.f32 %v387_v52, %v386_v48  ;;  %v403_v48 = vsel %vm375_vm4, %v357_v33, 0.0 }
  0x90   :  { %v289_v57 = vmul.f32 %v257_v53, %v604_v41  ;;  %v321_v58 = vmul.f32 %v610_v46, %v257_v53  ;;  %v288_v60 = vmul.f32 %v256_v54, %v604_v41  ;;  %v320_v61 = vmul.f32 %v610_v46, %v256_v54 }
  0x91   :  { %v390_v63 = vadd.f32 %v389_v55, %v388_v56  ;;  %v31_v55 = vld [vmem:[%s803_s0 + $0x98] sm:$0xff]  ;;  %v30_v56 = vld [vmem:[%s803_s0 + $0x90] sm:$0xff] }
  0x92   :  { %v353_v3 = vmax.f32 %v289_v57, %v321_v58  ;;  %v352_v4 = vmax.f32 %v288_v60, %v320_v61  ;;  %v267_v58 = vsub.f32 %v190_v31, %v32_v51 }
  0x93   :  { %v392_v5 = vadd.f32 %v391_v62, %v390_v63  ;;  %v360_v63 = vmax.f32 %v296_v49, %v328_v50 }
  0x94   :  { %v393_v8 = vsel %vm375_vm4, %v352_v4, 0.0  ;;  %v395_v14 = vsel %vm375_vm4, %v353_v3, 0.0  ;;  %v205_v2 = vpop.permute.xlu2 %204  ;;  %v331_v9 = vmul.f32 %v610_v46, %v267_v58 }
  0x95   :  { %v394_v10 = vadd.f32 %v393_v8, %v392_v5  ;;  %v155_v11 = vpop.permute.xlu1 %154  ;;  %v150_v12 = vpop.permute.xlu0 %149  ;;  %v299_v8 = vmul.f32 %v267_v58, %v604_v41  ;;  %v270_v22 = vsub.f32 %v205_v2, %v35_v13  ;;  %v39_v2 = vld [vmem:[%s803_s0 + $0xd8] sm:$0xff] }
  0x96   :  { %v260_v15 = vsub.f32 %v155_v11, %v25_v6  ;;  %v259_v16 = vsub.f32 %v150_v12, %v24_v7 }
  0x97   :  { %v396_v17 = vadd.f32 %v395_v14, %v394_v10  ;;  %v409_v10 = vsel %vm375_vm4, %v360_v63, 0.0  ;;  %v302_v33 = vmul.f32 %v270_v22, %v604_v41 }
  0x98   :  { %v292_v18 = vmul.f32 %v260_v15, %v604_v41  ;;  %v324_v19 = vmul.f32 %v610_v46, %v260_v15  ;;  %v291_v20 = vmul.f32 %v259_v16, %v604_v41  ;;  %v323_v21 = vmul.f32 %v610_v46, %v259_v16  ;;  %v34_v15 = vld [vmem:[%s803_s0 + $0xb0] sm:$0xff]  ;;  %v33_v16 = vld [vmem:[%s803_s0 + $0xa8] sm:$0xff] }
  0x99   :  { %v398_v28 = vadd.f32 %v397_v24, %v396_v17 }
  0x9a   :  { %v356_v25 = vmax.f32 %v292_v18, %v324_v19  ;;  %v355_v26 = vmax.f32 %v291_v20, %v323_v21  ;;  %v363_v18 = vmax.f32 %v299_v8, %v331_v9 }
  0x9c   :  { %v399_v32 = vsel %vm375_vm4, %v355_v26, 0.0  ;;  %v401_v38 = vsel %vm375_vm4, %v356_v25, 0.0  ;;  %v415_v31 = vsel %vm375_vm4, %v363_v18, 0.0 }
  0x9d   :  { %v400_v34 = vadd.f32 %v399_v32, %v398_v28  ;;  %v170_v35 = vpop.permute.xlu1 %169  ;;  %v165_v36 = vpop.permute.xlu0 %164 }
  0x9e   :  { %v263_v39 = vsub.f32 %v170_v35, %v28_v29  ;;  %v262_v40 = vsub.f32 %v165_v36, %v27_v30  ;;  %v220_v32 = vpop.permute.xlu2 %219  ;;  %v38_v35 = vld [vmem:[%s803_s0 + $0xd0] sm:$0xff] }
  0x9f   :  { %v402_v42 = vadd.f32 %v401_v38, %v400_v34  ;;  %v334_v34 = vmul.f32 %v610_v46, %v270_v22 }
  0xa0   :  { %v295_v43 = vmul.f32 %v263_v39, %v604_v41  ;;  %v327_v44 = vmul.f32 %v610_v46, %v263_v39  ;;  %v294_v45 = vmul.f32 %v262_v40, %v604_v41  ;;  %v326_v47 = vmul.f32 %v610_v46, %v262_v40  ;;  %v37_v39 = vld [vmem:[%s803_s0 + $0xc8] sm:$0xff]  ;;  %v36_v40 = vld [vmem:[%s803_s0 + $0xc0] sm:$0xff] }
  0xa1   :  { %v404_v54 = vadd.f32 %v403_v48, %v402_v42  ;;  %v366_v48 = vmax.f32 %v302_v33, %v334_v34 }
  0xa2   :  { %v359_v52 = vmax.f32 %v295_v43, %v327_v44  ;;  %v358_v53 = vmax.f32 %v294_v45, %v326_v47  ;;  %v273_v43 = vsub.f32 %v220_v32, %v38_v35 }
  0xa4   :  { %v405_v57 = vsel %vm375_vm4, %v358_v53, 0.0  ;;  %v407_v59 = vsel %vm375_vm4, %v359_v52, 0.0  ;;  %v337_v58 = vmul.f32 %v610_v46, %v273_v43 }
  0xa5   :  { %v406_v60 = vadd.f32 %v405_v57, %v404_v54  ;;  %v185_v61 = vpop.permute.xlu1 %184  ;;  %v180_v62 = vpop.permute.xlu0 %179  ;;  %v305_v57 = vmul.f32 %v273_v43, %v604_v41 }
  0xa6   :  { %v266_v0 = vsub.f32 %v185_v61, %v31_v55  ;;  %v265_v1 = vsub.f32 %v180_v62, %v30_v56  ;;  %v235_v63 = vpop.permute.xlu2 %234 }
  0xa7   :  { %v408_v3 = vadd.f32 %v407_v59, %v406_v60  ;;  %v421_v60 = vsel %vm375_vm4, %v366_v48, 0.0  ;;  %v41_v59 = vld [vmem:[%s803_s0 + $0xe8] sm:$0xff] }
  0xa8   :  { %v298_v4 = vmul.f32 %v266_v0, %v604_v41  ;;  %v330_v5 = vmul.f32 %v610_v46, %v266_v0  ;;  %v297_v6 = vmul.f32 %v265_v1, %v604_v41  ;;  %v329_v7 = vmul.f32 %v610_v46, %v265_v1  ;;  %v40_v1 = vld [vmem:[%s803_s0 + $0xe0] sm:$0xff] }
  0xa9   :  { %v410_v14 = vadd.f32 %v409_v10, %v408_v3  ;;  %v276_v8 = vsub.f32 %v235_v63, %v41_v59 }
  0xaa   :  { %v362_v11 = vmax.f32 %v298_v4, %v330_v5  ;;  %v361_v12 = vmax.f32 %v297_v6, %v329_v7  ;;  %v369_v4 = vmax.f32 %v305_v57, %v337_v58 }
  0xab   :  { %v308_v18 = vmul.f32 %v276_v8, %v604_v41 }
  0xac   :  { %v411_v17 = vsel %vm375_vm4, %v361_v12, 0.0  ;;  %v413_v23 = vsel %vm375_vm4, %v362_v11, 0.0 }
  0xad   :  { %v412_v19 = vadd.f32 %v411_v17, %v410_v14  ;;  %v200_v20 = vpop.permute.xlu1 %199  ;;  %v195_v21 = vpop.permute.xlu0 %194  ;;  %v427_v17 = vsel %vm375_vm4, %v369_v4, 0.0 }
  0xae   :  { %v269_v24 = vsub.f32 %v200_v20, %v34_v15  ;;  %v268_v25 = vsub.f32 %v195_v21, %v33_v16 }
  0xaf   :  { %v414_v26 = vadd.f32 %v413_v23, %v412_v19  ;;  %v340_v19 = vmul.f32 %v610_v46, %v276_v8  ;;  %v43_v23 = vld [vmem:[%s803_s0 + $0xf8] sm:$0x3] }
  0xb0   :  { %v301_v27 = vmul.f32 %v269_v24, %v604_v41  ;;  %v333_v28 = vmul.f32 %v610_v46, %v269_v24  ;;  %v300_v29 = vmul.f32 %v268_v25, %v604_v41  ;;  %v332_v30 = vmul.f32 %v610_v46, %v268_v25  ;;  %v42_v24 = vld [vmem:[%s803_s0 + $0xf0] sm:$0xff] }
  0xb1   :  { %v416_v38 = vadd.f32 %v415_v31, %v414_v26 }
  0xb2   :  { %v365_v36 = vmax.f32 %v301_v27, %v333_v28  ;;  %v364_v37 = vmax.f32 %v300_v29, %v332_v30  ;;  %v372_v29 = vmax.f32 %v308_v18, %v340_v19 }
  0xb4   :  { %v417_v42 = vsel %vm375_vm4, %v364_v37, 0.0  ;;  %v419_v49 = vsel %vm375_vm4, %v365_v36, 0.0 }
  0xb5   :  { %v418_v44 = vadd.f32 %v417_v42, %v416_v38  ;;  %v215_v45 = vpop.permute.xlu1 %214  ;;  %v210_v47 = vpop.permute.xlu0 %209 }
  0xb6   :  { %v272_v50 = vsub.f32 %v215_v45, %v37_v39  ;;  %v271_v51 = vsub.f32 %v210_v47, %v36_v40  ;;  %v433_v40 = vsel %vm375_vm4, %v372_v29, 0.0 }
  0xb7   :  { %v420_v52 = vadd.f32 %v419_v49, %v418_v44 }
  0xb8   :  { %v304_v53 = vmul.f32 %v272_v50, %v604_v41  ;;  %v336_v54 = vmul.f32 %v610_v46, %v272_v50  ;;  %v303_v55 = vmul.f32 %v271_v51, %v604_v41  ;;  %v335_v56 = vmul.f32 %v610_v46, %v271_v51 }
  0xb9   :  { %v422_v0 = vadd.f32 %v421_v60, %v420_v52 }
  0xba   :  { %v368_v61 = vmax.f32 %v304_v53, %v336_v54  ;;  %v367_v62 = vmax.f32 %v303_v55, %v335_v56 }
  0xbc   :  { %v423_v3 = vsel %vm375_vm4, %v367_v62, 0.0  ;;  %v425_v9 = vsel %vm375_vm4, %v368_v61, 0.0 }
  0xbd   :  { %v424_v5 = vadd.f32 %v423_v3, %v422_v0  ;;  %v230_v6 = vpop.permute.xlu1 %229  ;;  %v225_v7 = vpop.permute.xlu0 %224 }
  0xbe   :  { %v275_v10 = vsub.f32 %v230_v6, %v40_v1  ;;  %v274_v11 = vsub.f32 %v225_v7, %v39_v2 }
  0xbf   :  { %v426_v12 = vadd.f32 %v425_v9, %v424_v5 }
  0xc0   :  { %v307_v13 = vmul.f32 %v275_v10, %v604_v41  ;;  %v339_v14 = vmul.f32 %v610_v46, %v275_v10  ;;  %v306_v15 = vmul.f32 %v274_v11, %v604_v41  ;;  %v338_v16 = vmul.f32 %v610_v46, %v274_v11 }
  0xc1   :  { %v428_v22 = vadd.f32 %v427_v17, %v426_v12 }
  0xc2   :  { %v371_v20 = vmax.f32 %v307_v13, %v339_v14  ;;  %v370_v21 = vmax.f32 %v306_v15, %v338_v16 }
  0xc4   :  { %v429_v25 = vsel %vm375_vm4, %v370_v21, 0.0  ;;  %v431_v30 = vsel %vm375_vm4, %v371_v20, 0.0 }
  0xc5   :  { %v430_v26 = vadd.f32 %v429_v25, %v428_v22  ;;  %v245_v27 = vpop.permute.xlu1 %244  ;;  %v240_v28 = vpop.permute.xlu0 %239 }
  0xc6   :  { %v278_v31 = vsub.f32 %v245_v27, %v43_v23  ;;  %v277_v32 = vsub.f32 %v240_v28, %v42_v24 }
  0xc7   :  { %v432_v33 = vadd.f32 %v431_v30, %v430_v26 }
  0xc8   :  { %v310_v34 = vmul.f32 %v278_v31, %v604_v41  ;;  %v342_v35 = vmul.f32 %v610_v46, %v278_v31  ;;  %v309_v36 = vmul.f32 %v277_v32, %v604_v41  ;;  %v341_v37 = vmul.f32 %v610_v46, %v277_v32 }
  0xc9   :  { %v434_v42 = vadd.f32 %v433_v40, %v432_v33 }
  0xca   :  { %v373_v38 = vmax.f32 %v309_v36, %v341_v37  ;;  %v374_v39 = vmax.f32 %v310_v34, %v342_v35 }
  0xcc   :  { %v435_v43 = vsel %vm375_vm4, %v373_v38, 0.0  ;;  %v438_v45 = vsel %vm437_vm5, %v374_v39, 0.0 }
  0xcd   :  { %v436_v44 = vadd.f32 %v435_v43, %v434_v42 }
  0xcf   :  { %v439_v47 = vadd.f32 %v438_v45, %v436_v44 }
  0xd1   :  { %440 = vadd.xlane.f32.xlu2 %v439_v47 }
 0x144   :  { %v441_v48 = vpop.xlane.xlu2 %440 }
 0x145   :  { %v442_v49 = vrot.slane %v441_v48, 4 }
 0x147   :  { %v443_v50 = vadd.f32 %v442_v49, %v441_v48 }
 0x149   :  { %v444_v51 = vrot.slane %v443_v50, 2 }
 0x14b   :  { %v445_v52 = vadd.f32 %v444_v51, %v443_v50 }
 0x14d   :  { %v446_v41 = vrot.slane %v445_v52, 1 }
 0x14f   :  { %v447_v53 = vadd.f32 %v446_v41, %v445_v52 }
 0x151   :  { %468 = vpush %v447_v53 }
 0x182   :  { %s469_s24 = spop %468 }
 0x183   :  { %s449_s25 = smul.f32 0.004, %s469_s24 }
 0x185   :  { %451 = sst [smem:[#allocation2]] %s449_s25 }
 0x186   :  { %460 = dma.smem_to_hbm %s492_s26, 16, %s458_s23, [#allocation3]  }
 0x187   :  { %488 = dma.done.wait [#allocation3], 16  }
 0x188   :  { %489 = vsyncadd [#allocation3], 4294967280 }
 0x189   :  { %465 = sfence }
 0x18a   :  { %466 = vsyncpa [#allocation3], 1 }

</bundles_post_ra>
